<compile_context>
chip_gen: v7x
topology: tpu7x:2x2x1
jax: 0.10.0
libtpu: 0.0.40
codegen_flags: <defaults>
</compile_context>

<pallas_src>
import functools
import math

import jax
import jax.numpy as jnp
from jax.experimental import pallas as pl
from jax.experimental.pallas import tpu as pltpu


def _round_up(x, m):
    return ((x + m - 1) // m) * m


def _cos_theta_kernel(emb_ref, w_ref, invw_ref, out_ref, en_ref, *, sub_centers):
    """One (batch-tile, class-tile): normalize embeddings once per batch tile (scratch),
    bf16 MXU matmul per sub-center, per-column inverse-norm scale, running VPU max,
    clamp, lane-dense store."""

    # Normalize the embedding tile only on the first class tile; the normalized bf16
    # copy stays resident in VMEM scratch for all remaining class tiles of this row.
    @pl.when(pl.program_id(1) == 0)
    def _():
        e = emb_ref[...].astype(jnp.float32)
        ssq = jnp.sum(e * e, axis=1, keepdims=True)
        # 1/max(||e||, 1e-12) == rsqrt(max(||e||^2, 1e-24)); rsqrt goes to the EUP slot.
        inv = jax.lax.rsqrt(jnp.maximum(ssq, jnp.float32(1e-24)))
        en_ref[...] = (e * inv).astype(en_ref.dtype)

    e_n = en_ref[...]  # (bm, K) bf16

    # Sub-centers live on the leading weight axis, so the sub-center reduction is a
    # plain elementwise max over full (bm, tn) tiles (hidden under the MXU).
    cos = (jnp.dot(e_n, w_ref[0], preferred_element_type=jnp.float32)
           * invw_ref[0])                       # (bm, tn) * (1, tn)
    for s in range(1, sub_centers):
        cos = jnp.maximum(
            cos,
            jnp.dot(e_n, w_ref[s], preferred_element_type=jnp.float32) * invw_ref[s],
        )

    # clip is monotone, so clamping after the sub-center max matches clamp-then-max.
    out_ref[...] = jnp.clip(cos, -1.0, 1.0).astype(out_ref.dtype)


def cos_theta_pallas(embeddings, weight, *, out_features, sub_centers,
                     block_b=128, block_n=512):
    """cos_theta = clamp(normalize(E, dim=1) @ normalize(W, dim=0), -1, 1),
    then max over sub-centers.  E: (B, K) ; W: (K, out_features * sub_centers)."""
    B, in_features = embeddings.shape
    C = out_features * sub_centers
    assert weight.shape == (in_features, C)

    # ---- parameter-only preprocessing (plain JAX, done once per call) ----
    # Deinterleave sub-centers: torch column c = class*sub_centers + s  ->  w3[s, :, class].
    w3 = weight.reshape(in_features, out_features, sub_centers).transpose(2, 0, 1)
    col_norm = jnp.sqrt(
        jnp.sum(jnp.square(w3.astype(jnp.float32)), axis=1, keepdims=True)
    )                                                    # (sub, 1, out) f32
    inv_wnorm = 1.0 / jnp.maximum(col_norm, 1e-12)       # torch F.normalize eps
    w3_bf16 = w3.astype(jnp.bfloat16)                    # raw weight, bf16 for the MXU

    # ---- tile sizes / padding (lane-dense 128-multiple output tiles) ----
    bm = min(block_b, _round_up(B, 8))
    B_pad = _round_up(B, bm)
    tn = min(block_n, _round_up(out_features, 128))      # multiple of 128
    out_pad = _round_up(out_features, tn)

    emb_p = embeddings if B_pad == B else jnp.pad(embeddings, ((0, B_pad - B), (0, 0)))
    if out_pad != out_features:
        w3_bf16 = jnp.pad(w3_bf16, ((0, 0), (0, 0), (0, out_pad - out_features)))
        inv_wnorm = jnp.pad(inv_wnorm, ((0, 0), (0, 0), (0, out_pad - out_features)))

    kernel = functools.partial(_cos_theta_kernel, sub_centers=sub_centers)
    out = pl.pallas_call(
        kernel,
        out_shape=jax.ShapeDtypeStruct((B_pad, out_pad), jnp.float32),
        grid=(B_pad // bm, out_pad // tn),
        in_specs=[
            # embedding tile stays resident across the inner class axis
            pl.BlockSpec((bm, in_features), lambda i, j: (i, 0)),
            # weight tiled over classes -> double-buffered DMA, VMEM-independent of C
            pl.BlockSpec((sub_centers, in_features, tn), lambda i, j: (0, 0, j)),
            # per-column inverse norms for this class tile
            pl.BlockSpec((sub_centers, 1, tn), lambda i, j: (0, 0, j)),
        ],
        out_specs=pl.BlockSpec((bm, tn), lambda i, j: (i, j)),
        scratch_shapes=[pltpu.VMEM((bm, in_features), jnp.bfloat16)],
        compiler_params=pltpu.CompilerParams(
            # batch axis parallel (megacore); class axis arbitrary so the per-batch-tile
            # e_n scratch written under pl.when(j == 0) is always initialized in order.
            dimension_semantics=("parallel", "arbitrary"),
            vmem_limit_bytes=48 * 1024 * 1024,
        ),
    )(emb_p, w3_bf16, inv_wnorm)

    return out[:B, :out_features]


class CurricularAAMPallas:
    """JAX/Pallas re-implementation of CurricularAAM's forward pass."""

    def __init__(self, in_features, out_features, sub_centers=1, m=0.35, s=32.0, seed=0):
        self.in_features = in_features
        self.out_features = out_features
        self.sub_centers = sub_centers
        self.m = m
        self.s = s
        self.cos_m = math.cos(m)
        self.sin_m = math.sin(m)
        self.threshold = math.cos(math.pi - m)
        self.mm = math.sin(math.pi - m) * m
        # nn.init.normal_(self.kernel, std=0.01) — deterministic synthetic init.
        key = jax.random.PRNGKey(seed)
        self.kernel = 0.01 * jax.random.normal(
            key, (in_features, out_features * sub_centers), dtype=jnp.float32
        )
        self.t = jnp.zeros((1,), dtype=jnp.float32)  # running buffer (functional update)

    def forward(self, embeddings, label=None, training=False):
        cos_theta = cos_theta_pallas(
            embeddings,
            self.kernel,
            out_features=self.out_features,
            sub_centers=self.sub_centers,
        )
        if not training:
            return cos_theta

        # --- training branch: curricular margin (elementwise glue in plain JAX) ---
        origin_cos = cos_theta
        B = embeddings.shape[0]
        target_logit = cos_theta[jnp.arange(B), label].reshape(-1, 1)
        sin_theta = jnp.sqrt(1.0 - jnp.square(target_logit))
        cos_theta_m = target_logit * self.cos_m - sin_theta * self.sin_m
        mask = cos_theta > cos_theta_m
        final_target_logit = jnp.where(
            target_logit > self.threshold, cos_theta_m, target_logit - self.mm
        )
        new_t = target_logit.mean() * 0.01 + (1.0 - 0.01) * self.t  # buffer update (returned)
        hard = cos_theta * (new_t[0] + cos_theta)
        cos_theta = jnp.where(mask, hard, cos_theta)
        one_hot = jax.nn.one_hot(label, self.out_features, dtype=jnp.bool_)
        cos_theta = jnp.where(one_hot, final_target_logit, cos_theta)  # scatter_ on label col
        return cos_theta * self.s, origin_cos * self.s, new_t


def _cos_theta_reference(embeddings, weight, out_features, sub_centers):
    eps = 1e-12
    e_n = embeddings / jnp.maximum(
        jnp.linalg.norm(embeddings, axis=1, keepdims=True), eps
    )
    w_n = weight / jnp.maximum(jnp.linalg.norm(weight, axis=0, keepdims=True), eps)
    cos = jnp.clip(e_n @ w_n, -1.0, 1.0)
    if sub_centers > 1:
        cos = cos.reshape(-1, out_features, sub_centers).max(axis=-1)
    return cos


if __name__ == "__main__":
    B, in_features, out_features, sub_centers = 16, 32, 16, 2

    key = jax.random.PRNGKey(0)
    k_emb, k_lbl = jax.random.split(key)
    embeddings = jax.random.normal(k_emb, (B, in_features), dtype=jnp.float32)
    labels = jax.random.randint(k_lbl, (B,), 0, out_features)

    head = CurricularAAMPallas(in_features, out_features, sub_centers=sub_centers, seed=0)

    # eval-mode forward (inference hot path runs in the Pallas kernel)
    cos_theta = head.forward(embeddings, training=False)
    cos_theta = jax.block_until_ready(cos_theta)

    ref = _cos_theta_reference(embeddings, head.kernel, out_features, sub_centers)
    assert cos_theta.shape == (B, out_features)
    # bf16 MXU inputs (f32 accumulate / normalization / scaling) -> ~1e-2-level agreement
    assert jnp.allclose(cos_theta, ref, atol=2e-2, rtol=2e-2), "mismatch vs reference"

    # training-mode forward (margin glue on top of the same kernel)
    out, origin, new_t = head.forward(embeddings, label=labels, training=True)
    jax.block_until_ready(out)
    jax.block_until_ready(origin)
    jax.block_until_ready(new_t)
    assert out.shape == (B, out_features) and origin.shape == (B, out_features)

    print("KERNEL_OK")
</pallas_src>

<mosaic_0001>
module attributes {stable_mosaic.version = 11 : i64} {
  func.func @_cos_theta_kernel(%arg0: i32, %arg1: i32, %arg2: memref<16x32xf32, #tpu.memory_space<vmem>>, %arg3: memref<2x32x128xbf16, #tpu.memory_space<vmem>>, %arg4: memref<2x1x128xf32, #tpu.memory_space<vmem>>, %arg5: memref<16x128xf32, #tpu.memory_space<vmem>>, %arg6: memref<16x32xbf16, #tpu.memory_space<vmem>>) attributes {dimension_semantics = [#tpu.dimension_semantics<parallel>, #tpu.dimension_semantics<arbitrary>], iteration_bounds = array<i64: 1, 1>, scalar_prefetch = 0 : i64, scratch_operands = 1 : i64, tpu.core_type = #tpu.core_type<tc>, window_params = [{transform_indices = @transform_0, window_bounds = array<i64: 16, 32>}, {transform_indices = @transform_1, window_bounds = array<i64: 2, 32, 128>}, {transform_indices = @transform_2, window_bounds = array<i64: 2, 1, 128>}, {transform_indices = @transform_3, window_bounds = array<i64: 16, 128>}]} {
    %c0_i32 = arith.constant 0 : i32
    %0 = arith.cmpi eq, %arg1, %c0_i32 : i32
    %1 = arith.extui %0 : i1 to i32
    %c0_i32_0 = arith.constant 0 : i32
    %2 = arith.cmpi ne, %1, %c0_i32_0 : i32
    scf.if %2 {
      %c0_18 = arith.constant 0 : index
      %c0_19 = arith.constant 0 : index
      %24 = vector.load %arg2[%c0_18, %c0_19] : memref<16x32xf32, #tpu.memory_space<vmem>>, vector<16x32xf32>
      %25 = arith.mulf %24, %24 : vector<16x32xf32>
      %cst_20 = arith.constant dense<0.000000e+00> : vector<16xf32>
      %26 = vector.multi_reduction <add>, %25, %cst_20 [1] : vector<16x32xf32> to vector<16xf32>
      %27 = vector.shape_cast %26 : vector<16xf32> to vector<16x1xf32>
      %cst_21 = arith.constant 1.000000e-24 : f32
      %28 = vector.broadcast %cst_21 : f32 to vector<16x1xf32>
      %29 = arith.maximumf %27, %28 : vector<16x1xf32>
      %30 = math.rsqrt %29 : vector<16x1xf32>
      %31 = vector.broadcast %30 : vector<16x1xf32> to vector<16x32xf32>
      %32 = arith.mulf %24, %31 : vector<16x32xf32>
      %33 = arith.truncf %32 : vector<16x32xf32> to vector<16x32xbf16>
      %c0_22 = arith.constant 0 : index
      %c0_23 = arith.constant 0 : index
      %34 = vector.load %arg6[%c0_22, %c0_23] : memref<16x32xbf16, #tpu.memory_space<vmem>>, vector<16x32xbf16>
      tpu.vector_store %arg6[%c0_22, %c0_23], %33 {strides = array<i32>} : memref<16x32xbf16, #tpu.memory_space<vmem>>, vector<16x32xbf16>,
    } else {
    }
    %c0 = arith.constant 0 : index
    %c0_1 = arith.constant 0 : index
    %3 = vector.load %arg6[%c0, %c0_1] : memref<16x32xbf16, #tpu.memory_space<vmem>>, vector<16x32xbf16>
    %c0_2 = arith.constant 0 : index
    %c0_3 = arith.constant 0 : index
    %c0_4 = arith.constant 0 : index
    %4 = vector.load %arg3[%c0_2, %c0_3, %c0_4] : memref<2x32x128xbf16, #tpu.memory_space<vmem>>, vector<1x32x128xbf16>
    %5 = vector.shape_cast %4 : vector<1x32x128xbf16> to vector<32x128xbf16>
    %cst = arith.constant dense<0.000000e+00> : vector<16x128xf32>
    %6 = tpu.matmul %3, %5, %cst {dimension_numbers = #tpu.dot_dimension_numbers<[1], [0], [0], [1], [0, 0, 1, 1], [], []>} : vector<16x32xbf16>, vector<32x128xbf16>, vector<16x128xf32> -> vector<16x128xf32>
    %c0_5 = arith.constant 0 : index
    %c0_6 = arith.constant 0 : index
    %c0_7 = arith.constant 0 : index
    %7 = vector.load %arg4[%c0_5, %c0_6, %c0_7] : memref<2x1x128xf32, #tpu.memory_space<vmem>>, vector<1x1x128xf32>
    %8 = vector.shape_cast %7 : vector<1x1x128xf32> to vector<1x128xf32>
    %9 = vector.broadcast %8 : vector<1x128xf32> to vector<16x128xf32>
    %10 = arith.mulf %6, %9 : vector<16x128xf32>
    %c1 = arith.constant 1 : index
    %c0_8 = arith.constant 0 : index
    %c0_9 = arith.constant 0 : index
    %11 = vector.load %arg3[%c1, %c0_8, %c0_9] : memref<2x32x128xbf16, #tpu.memory_space<vmem>>, vector<1x32x128xbf16>
    %12 = vector.shape_cast %11 : vector<1x32x128xbf16> to vector<32x128xbf16>
    %cst_10 = arith.constant dense<0.000000e+00> : vector<16x128xf32>
    %13 = tpu.matmul %3, %12, %cst_10 {dimension_numbers = #tpu.dot_dimension_numbers<[1], [0], [0], [1], [0, 0, 1, 1], [], []>} : vector<16x32xbf16>, vector<32x128xbf16>, vector<16x128xf32> -> vector<16x128xf32>
    %c1_11 = arith.constant 1 : index
    %c0_12 = arith.constant 0 : index
    %c0_13 = arith.constant 0 : index
    %14 = vector.load %arg4[%c1_11, %c0_12, %c0_13] : memref<2x1x128xf32, #tpu.memory_space<vmem>>, vector<1x1x128xf32>
    %15 = vector.shape_cast %14 : vector<1x1x128xf32> to vector<1x128xf32>
    %16 = vector.broadcast %15 : vector<1x128xf32> to vector<16x128xf32>
    %17 = arith.mulf %13, %16 : vector<16x128xf32>
    %18 = arith.maximumf %10, %17 : vector<16x128xf32>
    %cst_14 = arith.constant -1.000000e+00 : f32
    %cst_15 = arith.constant 1.000000e+00 : f32
    %19 = vector.broadcast %cst_14 : f32 to vector<16x128xf32>
    %20 = arith.maximumf %19, %18 : vector<16x128xf32>
    %21 = vector.broadcast %cst_15 : f32 to vector<16x128xf32>
    %22 = arith.minimumf %21, %20 : vector<16x128xf32>
    %c0_16 = arith.constant 0 : index
    %c0_17 = arith.constant 0 : index
    %23 = vector.load %arg5[%c0_16, %c0_17] : memref<16x128xf32, #tpu.memory_space<vmem>>, vector<16x128xf32>
    tpu.vector_store %arg5[%c0_16, %c0_17], %22 {strides = array<i32>} : memref<16x128xf32, #tpu.memory_space<vmem>>, vector<16x128xf32>,
    return
  }
  func.func @transform_0(%arg0: i32, %arg1: i32) -> (i32, i32) {
    %c0_i32 = arith.constant 0 : i32
    %c0_i32_0 = arith.constant 0 : i32
    return %arg0, %c0_i32 : i32, i32
  }
  func.func @transform_1(%arg0: i32, %arg1: i32) -> (i32, i32, i32) {
    %c0_i32 = arith.constant 0 : i32
    %c0_i32_0 = arith.constant 0 : i32
    %c0_i32_1 = arith.constant 0 : i32
    return %c0_i32, %c0_i32_0, %arg1 : i32, i32, i32
  }
  func.func @transform_2(%arg0: i32, %arg1: i32) -> (i32, i32, i32) {
    %c0_i32 = arith.constant 0 : i32
    %c0_i32_0 = arith.constant 0 : i32
    %c0_i32_1 = arith.constant 0 : i32
    return %c0_i32, %c0_i32_0, %arg1 : i32, i32, i32
  }
  func.func @transform_3(%arg0: i32, %arg1: i32) -> (i32, i32) {
    %c0_i32 = arith.constant 0 : i32
    return %arg0, %arg1 : i32, i32
  }
}

</mosaic_0001>

<bundles_post_ra>
// kernel: tpu_custom_call.1
= control target key start
LH: loop header
LB: loop body
LE: loop exit
PB: predicated region body
PF: predicated region fallthrough
CT: control target
= control target key end

     0   :  { %8 = vsyncpa [#allocation4], 0  ;;  %s436_s0 = inlined_call_operand.hbm [shape: f32[16,32], index: 0, kind: input, shape index: {}]   ;;  %s437_s1 = inlined_call_operand.hbm [shape: bf16[2,32,128], index: 1, kind: input, shape index: {}]   ;;  %s438_s2 = inlined_call_operand.vmem [shape: f32[2,1,128], index: 2, kind: input, shape index: {}]   ;;  %s439_s3 = inlined_call_operand.hbm [shape: f32[16,128], index: 3, kind: output, shape index: {}]  }
   0x1   :  { %9 = vsyncpa [#allocation7], 0 }
   0x2   :  { %10 = vsyncpa [#allocation5], 0  ;;  %s354_s12 = smov [#allocation3]   ;;  %s282_s16 = scalar_lea.hbm %s436_s0, 256 }
   0x3   :  { %s16_s13 = sshll.u32 %s354_s12, 4  ;;  %p283_p0 = scmp.ne.s32.totalorder %s436_s0, %s282_s16  ;;  %s17_s13 = int_to_ptr.vmem [resolvable:$true] %s16_s13 }
   0x4   :  { %p286_p1 = scmp.lt.u32.totalorder %s282_s16, %s436_s0 }
   0x6   :  { %p288_p2 = pnand %p286_p1, %p283_p0 }
   0x8   :  { %291 = shalt.err (!%p288_p2)
}
   0x9   :  { %s292_s21 = scalar_lea.vmem %s17_s13, 256  ;;  %p297_p4 = scmp.lt.s32.totalorder %s17_s13, %s17_s13 }
   0xa   :  { %p293_p3 = scmp.ne.s32.totalorder %s17_s13, %s292_s21  ;;  %p298_p5 = scmp.lt.s32.totalorder %s292_s21, %s292_s21 }
   0xc   :  { %p299_p6 = por %p298_p5, %p297_p4 }
   0xe   :  { %p300_p7 = pnand %p299_p6, %p293_p3 }
  0x10   :  { %303 = shalt.err (!%p300_p7)
}
  0x11   :  { %s355_s22 = smov 128   ;;  %s356_s23 = smov 8  }
  0x12   :  { %22 = dma.hbm_to_vmem [thread:$0]  %s436_s0, 256, %s17_s13, [#allocation4], %s355_s22, %s355_s22, %s356_s23  }
  0x13   :  { %s357_s26 = smov [#allocation6]   ;;  %s304_s30 = scalar_lea.hbm %s437_s1, 512 }
  0x14   :  { %s28_s27 = sshll.u32 %s357_s26, 4  ;;  %p305_p8 = scmp.ne.s32.totalorder %s437_s1, %s304_s30  ;;  %s29_s27 = int_to_ptr.vmem [resolvable:$true] %s28_s27 }
  0x15   :  { %p308_p9 = scmp.lt.u32.totalorder %s304_s30, %s437_s1 }
  0x17   :  { %p310_p10 = pnand %p308_p9, %p305_p8 }
  0x19   :  { %313 = shalt.err (!%p310_p10)
}
  0x1a   :  { %s314_s8 = scalar_lea.vmem %s29_s27, 512  ;;  %p319_p12 = scmp.lt.s32.totalorder %s29_s27, %s29_s27 }
  0x1b   :  { %p315_p11 = scmp.ne.s32.totalorder %s29_s27, %s314_s8  ;;  %p320_p13 = scmp.lt.s32.totalorder %s314_s8, %s314_s8 }
  0x1d   :  { %p321_p0 = por %p320_p13, %p319_p12 }
  0x1f   :  { %p322_p1 = pnand %p321_p0, %p315_p11 }
  0x21   :  { %325 = shalt.err (!%p322_p1)
}
  0x22   :  { %s358_s0 = smov 64   ;;  %s359_s9 = smov 4  }
  0x23   :  { %34 = dma.hbm_to_vmem [thread:$0]  %s437_s1, 512, %s29_s27, [#allocation7], %s358_s0, %s358_s0, %s359_s9  }
  0x24   :  { %348 = dma.done.wait [#allocation4], 256  }
  0x25   :  { %349 = vsyncadd [#allocation4], 4294967040 }
  0x26   :  { %350 = dma.done.wait [#allocation7], 512  }
  0x27   :  { %351 = vsyncadd [#allocation7], 4294966784  ;;  %v48_v0 = vld [vmem:[#allocation3] sm:$0xff]  ;;  %vm52_vm0 = vcmask 261120   ;;  %v49_v1 = vld [vmem:[#allocation3 + $0x8] sm:$0xff]  ;;  %v360_v8 = vmov 0.0  }
  0x28   :  { %v50_v2 = vmul.f32 %v48_v0, %v48_v0  ;;  %v51_v3 = vmul.f32 %v49_v1, %v49_v1  ;;  %v274_v6 = vld [vmem:[#allocation6] sm:$0xff]   ;;  %v275_v7 = vld [vmem:[#allocation6 + $0x10] sm:$0xff]   ;;  %249 = vmatprep.subr.bf16.mxu0 %v360_v8  ;;  %257 = vmatprep.subr.bf16.mxu1 %v360_v8  ;;  %v276_v9 = vld [vmem:[#allocation6 + $0x8] sm:$0xff]   ;;  %vm361_vm1 = vmmov 0   ;;  %s362_s15 = smov [#allocation8]  }
  0x29   :  { %250 = vmatpush3.bf16.msra.mxu0 %v274_v6  ;;  %258 = vmatpush3.bf16.msra.mxu1 %v275_v7  ;;  %v277_v10 = vld [vmem:[#allocation6 + $0x18] sm:$0xff]   ;;  %v235_v21 = vld [vmem:[%s438_s2] ss:$0 sm:$0xff]  ;;  %v240_v22 = vld [vmem:[%s438_s2 + $0x1] ss:$0 sm:$0xff]  ;;  %s219_s16 = sshll.u32 %s362_s15, 4  ;;  %s220_s16 = int_to_ptr.vmem [resolvable:$true] %s219_s16 }
  0x2a   :  { %v53_v4 = vsel %vm52_vm0, %v50_v2, 0.0  ;;  %v56_v5 = vsel %vm52_vm0, %v51_v3, 0.0  ;;  %251 = vmatprep.subr.bf16.mxu0 %v360_v8  ;;  %259 = vmatprep.subr.bf16.mxu1 %v360_v8  ;;  %s326_s2 = scalar_lea.vmem %s220_s16, 256  ;;  %p331_p3 = scmp.lt.s32.totalorder %s220_s16, %s220_s16 }
  0x2b   :  { %54 = vadd.xlane.f32.xlu0 %v53_v4  ;;  %253 = vmatprep.mubr.msk.bf16.mxu0 %vm361_vm1, %v360_v8  ;;  %p327_p2 = scmp.ne.s32.totalorder %s220_s16, %s326_s2  ;;  %p332_p4 = scmp.lt.s32.totalorder %s326_s2, %s326_s2 }
  0x2c   :  { %261 = vmatprep.mubr.msk.bf16.mxu1 %vm361_vm1, %v360_v8 }
  0x2d   :  { %252 = vmatpush3.bf16.msra.mxu0 %v276_v9  ;;  %260 = vmatpush3.bf16.msra.mxu1 %v277_v10  ;;  %p333_p5 = por %p332_p4, %p331_p3 }
  0x2f   :  { %57 = vadd.xlane.f32.xlu0 %v56_v5  ;;  %p334_p6 = pnand %p333_p5, %p327_p2 }
  0xb8   :  { %v55_v11 = vpop.xlane.xlu0 %54 }
  0xb9   :  { %v59_v12 = vmax.f32 %v55_v11, 1e-24 }
  0xbb   :  { %278 = vrsqrt.f32 %v59_v12 }
  0xbc   :  { %v58_v13 = vpop.xlane.xlu0 %57 }
  0xbd   :  { %v60_v14 = vmax.f32 %v58_v13, 1e-24 }
  0xbf   :  { %280 = vrsqrt.f32 %v60_v14 }
  0xc5   :  { %v279_v15 = vpop.eup %278 }
  0xc6   :  { %v63_v17 = vmul.f32 %v279_v15, %v48_v0 }
  0xc9   :  { %v281_v16 = vpop.eup %280 }
  0xca   :  { %v64_v18 = vmul.f32 %v281_v16, %v49_v1 }
  0xcc   :  { %v65_v19 = vpack.c.bf16 %v64_v18, %v63_v17 }
  0xce   :  { %66 = vst.msk [vmem:[#allocation2] sm:$0xff] %vm52_vm0, %v65_v19 }
  0xd5   :  { %v67_v20 = vld [vmem:[#allocation2] sm:$0xff] }
  0xd6   :  { %254 = vmatmul.mubr.msk.bf16.vlgmr.msra.gmra.mrb[0].mxu0 %vm52_vm0, %v67_v20  ;;  %262 = vmatmul.mubr.msk.bf16.vlgmr.msra.gmra.mrb[0].mxu1 %vm52_vm0, %v67_v20 }
 0x1a9   :  { %v122_v23 = vpop.f32.mrb[0].mxu0  ;;  %v189_v24 = vpop.f32.mrb[0].mxu1 }
 0x1aa   :  { %v136_v25 = vmul.f32 %v235_v21, %v122_v23  ;;  %v204_v26 = vmul.f32 %v240_v22, %v189_v24  ;;  %v255_v27 = vpop.f32.mrb[1].mxu0  ;;  %v263_v28 = vpop.f32.mrb[1].mxu1 }
 0x1ab   :  { %v125_v29 = vpop.f32.mrb[2].mxu0  ;;  %v192_v30 = vpop.f32.mrb[2].mxu1 }
 0x1ac   :  { %v206_v31 = vmax.f32 %v136_v25, %v204_v26  ;;  %v137_v32 = vmul.f32 %v235_v21, %v125_v29  ;;  %v205_v33 = vmul.f32 %v240_v22, %v192_v30  ;;  %v256_v34 = vpop.f32.mrb[3].mxu0  ;;  %v264_v35 = vpop.f32.mrb[3].mxu1 }
 0x1ae   :  { %v241_v36 = vclamps-f32 %v206_v31, 1.0  ;;  %v207_v37 = vmax.f32 %v137_v32, %v205_v33 }
 0x1b0   :  { %212 = vst [vmem:[#allocation8] sm:$0xff] %v241_v36  ;;  %v242_v38 = vclamps-f32 %v207_v37, 1.0 }
 0x1b2   :  { %213 = vst [vmem:[#allocation8 + $0x8] sm:$0xff] %v242_v38 }
 0x1b3   :  { %337 = shalt.err (!%p334_p6)
}
 0x1b4   :  { %s338_s19 = scalar_lea.hbm %s439_s3, 256 }
 0x1b5   :  { %p339_p7 = scmp.ne.s32.totalorder %s439_s3, %s338_s19  ;;  %p342_p8 = scmp.lt.u32.totalorder %s338_s19, %s439_s3 }
 0x1b7   :  { %p344_p9 = pnand %p342_p8, %p339_p7 }
 0x1b9   :  { %347 = shalt.err (!%p344_p9)
}
 0x1ba   :  { %225 = dma.vmem_to_hbm [thread:$0]  %s220_s16, 256, %s439_s3, [#allocation5], %s355_s22, %s355_s22, %s356_s23  }
 0x1bb   :  { %352 = dma.done.wait [#allocation5], 256  }
 0x1bc   :  { %353 = vsyncadd [#allocation5], 4294967040 }
 0x1bd   :  { %229 = vsyncpa [#allocation4], 1 }
 0x1be   :  { %230 = vsyncpa [#allocation7], 1 }
 0x1bf   :  { %231 = vsyncpa [#allocation5], 1 }

</bundles_post_ra>
